<compile_context>
chip_gen: v7x
topology: tpu7x:2x2x1
jax: 0.10.0
libtpu: 0.0.40
codegen_flags: <defaults>
</compile_context>

<pallas_src>
import functools

import numpy as np
import jax
import jax.numpy as jnp
from jax.experimental import pallas as pl
from jax.experimental.pallas import tpu as pltpu

_LANE = 128


# ----------------------------------------------------------------------------------
# Pallas kernel: full FNO2d forward for one batch tile (both spectral layers fused).
# ----------------------------------------------------------------------------------
def fno2d_kernel(x_ref, fb_ref, ib_ref, wre_ref, wim_ref,
                 cw01_ref, cb01_ref, w1w_ref, w1b_ref, o_ref, s_ref):
    Bt, C, HW = x_ref.shape
    C2 = 2 * C
    Kp = wre_ref.shape[-1]                              # lane-padded kept-mode count

    x = x_ref[...]                                      # (Bt, C, HW) f32
    x_bf3 = x.astype(jnp.bfloat16)                      # reused by DFT + conv matmuls
    x_bf2 = x_bf3.reshape(Bt * C, HW)

    # ---- forward partial rDFT: ONE bf16 MXU matmul shared by BOTH spectral layers.
    xf = jnp.dot(x_bf2, fb_ref[...], preferred_element_type=jnp.float32)  # (Bt*C, 2Kp)
    xf = xf.reshape(Bt, C, 2 * Kp)                      # cols: [Re(0:Kp) | Im(Kp:2Kp)]

    # ---- streamed complex mode mixing (VPU), both layers at once (outputs stacked to 2C):
    #        ore[b,o,k] = sum_i xre[b,i,k]*wre[i,o,k] - xim[b,i,k]*wim[i,o,k]
    #        oim[b,o,k] = sum_i xre[b,i,k]*wim[i,o,k] + xim[b,i,k]*wre[i,o,k]
    #      128-lane chunks over Kp; per-chunk f32 accumulators stay in vregs; per-channel
    #      bf16 weight slices are loaded from VMEM and upcast just before use.  The big
    #      (Bt, C, 2C, Kp) broadcast intermediate of the old version is never built.
    #      (Static loops: C and Kp//128 are small; for very large C switch to fori_loop
    #       over a VMEM-resident spectrum.)
    for c0 in range(0, Kp, _LANE):
        acc_re = jnp.zeros((Bt, C2, _LANE), jnp.float32)
        acc_im = jnp.zeros((Bt, C2, _LANE), jnp.float32)
        for i in range(C):
            xre_i = xf[:, i:i + 1, c0:c0 + _LANE]                         # (Bt, 1, 128)
            xim_i = xf[:, i:i + 1, Kp + c0:Kp + c0 + _LANE]               # (Bt, 1, 128)
            wre_i = wre_ref[i:i + 1, :, c0:c0 + _LANE].astype(jnp.float32)  # (1, 2C, 128)
            wim_i = wim_ref[i:i + 1, :, c0:c0 + _LANE].astype(jnp.float32)
            acc_re = acc_re + xre_i * wre_i - xim_i * wim_i
            acc_im = acc_im + xre_i * wim_i + xim_i * wre_i
        # mixed spectrum goes straight into the bf16 VMEM scratch (rows = (b, o))
        s_ref[:, c0:c0 + _LANE] = acc_re.reshape(Bt * C2, _LANE).astype(jnp.bfloat16)
        s_ref[:, Kp + c0:Kp + c0 + _LANE] = (
            acc_im.reshape(Bt * C2, _LANE).astype(jnp.bfloat16))

    # ---- inverse partial rDFT: ONE bf16 MXU matmul for both layers (M = Bt*2C).
    y = jnp.dot(s_ref[...], ib_ref[...], preferred_element_type=jnp.float32)  # (Bt*2C, HW)
    y = y.reshape(Bt, C2, HW)

    # ---- fused 1x1 convs (conv0.con / conv1.con stacked) + untrained PReLU (alpha=0.25).
    #      Kept as one batched bf16 matmul over the (small) channel contraction; the
    #      (Bt, 2C, C) weight copy is tiny next to the activations and keeps the output in
    #      the (b, o, hw) layout needed downstream (no relayout/transpose).
    cw01 = jnp.broadcast_to(cw01_ref[...], (Bt, C2, C))                 # bf16
    pre = jnp.einsum('boi,bik->bok', cw01, x_bf3,
                     preferred_element_type=jnp.float32) + cb01_ref[...][None]
    z = y + pre
    z = jnp.where(z >= 0, z, 0.25 * z)

    # ---- FNO2d.forward residual wiring:
    #   y0 = conv0(x); x3 = y0 + x; y1 = conv1(x); x4 = y1 + x3; x4 = w1(x4); out = x4 + x
    #   (x2 = self.w1(x) in the PyTorch code is dead and skipped.)
    s_res = z[:, :C, :] + z[:, C:, :] + x               # (Bt, C, HW) f32
    w1 = jnp.broadcast_to(w1w_ref[...], (Bt, C, C))     # bf16
    x4 = jnp.einsum('boi,bik->bok', w1, s_res.astype(jnp.bfloat16),
                    preferred_element_type=jnp.float32) + w1b_ref[...][None]
    o_ref[...] = x4 + x


# ----------------------------------------------------------------------------------
# Host-side helpers: cached partial (r)DFT bases, packed weights, tiling plan.
# ----------------------------------------------------------------------------------
_BASIS_CACHE = {}


def build_basis(H, W, m, Kp):
    """Fused forward/inverse partial-rDFT bases, cached per (H, W, m, Kp)."""
    key = (H, W, m, Kp)
    if key in _BASIS_CACHE:
        return _BASIS_CACHE[key]
    K = 2 * m * m
    assert 2 * m <= H and m <= W // 2
    kx = np.concatenate([np.arange(m), np.arange(H - m, H)]).astype(np.float64)  # (2m,)
    ky = np.arange(m).astype(np.float64)                                          # (m,)
    h = np.arange(H, dtype=np.float64)
    w = np.arange(W, dtype=np.float64)
    theta = 2.0 * np.pi * (kx[None, None, :, None] * h[:, None, None, None] / H
                           + ky[None, None, None, :] * w[None, :, None, None] / W)
    cos = np.cos(theta).reshape(H * W, K)
    sin = np.sin(theta).reshape(H * W, K)
    # forward partial rfft2: exp(-i*theta) -> fused columns [Re | Im] = [cos | -sin]
    fb = np.zeros((H * W, 2 * Kp), np.float32)
    fb[:, :K] = cos
    fb[:, Kp:Kp + K] = -sin
    # inverse: (1/(H*W)) * c * Re(Z*exp(+i*theta)), Hermitian doubling c=2 for ky>0
    c = np.where(ky == 0, 1.0, 2.0)[None, None, None, :]
    ire = (c * np.cos(theta) / (H * W)).reshape(H * W, K)
    iim = (-c * np.sin(theta) / (H * W)).reshape(H * W, K)
    ib = np.zeros((2 * Kp, H * W), np.float32)
    ib[:K, :] = ire.T
    ib[Kp:Kp + K, :] = iim.T
    out = (jnp.asarray(fb, jnp.bfloat16), jnp.asarray(ib, jnp.bfloat16))
    _BASIS_CACHE[key] = out
    return out


def pack_spectral_weights(w1c0, w2c0, w1c1, w2c1, Kp):
    """Pack both layers' complex mode weights into bf16 (C, 2C, Kp) re/im planes."""
    def flat(w1c, w2c):
        wc = jnp.concatenate([w1c, w2c], axis=2)        # (C, C, 2m, m), k = r*m + s
        C = wc.shape[0]
        K = wc.shape[2] * wc.shape[3]
        return jnp.real(wc).reshape(C, C, K), jnp.imag(wc).reshape(C, C, K)
    r0, i0 = flat(w1c0, w2c0)
    r1, i1 = flat(w1c1, w2c1)
    wre = jnp.concatenate([r0, r1], axis=1)             # (C, 2C, K) indexed [i, o, k]
    wim = jnp.concatenate([i0, i1], axis=1)
    K = wre.shape[-1]
    pad = ((0, 0), (0, 0), (0, Kp - K))
    return (jnp.pad(wre, pad).astype(jnp.bfloat16),
            jnp.pad(wim, pad).astype(jnp.bfloat16))


def _chip_params():
    """Generation-aware budgets: VMEM cap for the scoped limit, cores, MXU row target."""
    kind = ""
    try:
        kind = jax.devices()[0].device_kind.lower()
    except Exception:
        pass
    if "v5" in kind:
        return {"name": "v5e", "vmem_cap": 100 << 20, "cores": 1, "rows": 128}
    if "v6" in kind:
        return {"name": "v6e", "vmem_cap": 112 << 20, "cores": 1, "rows": 256}
    if "7" in kind:
        return {"name": "v7x", "vmem_cap": 56 << 20, "cores": 2, "rows": 256}
    return {"name": "tpu", "vmem_cap": 56 << 20, "cores": 2, "rows": 256}  # conservative


def _const_bytes(C, HW, Kp):
    dft = 2 * HW * 2 * Kp * 2                 # fb + ib (bf16)
    spectral = 2 * C * 2 * C * Kp * 2         # wre + wim (bf16)
    small = (2 * C * C + 2 * C + C * C + C) * 4
    return dft + spectral + small


def _step_vmem_bytes(Bt, C, HW, Kp):
    xblk = Bt * C * HW * 4                    # x block (double-buffered)
    oblk = Bt * C * HW * 4                    # out block (double-buffered)
    spec = Bt * 2 * C * 2 * Kp * 2            # bf16 mixed-spectrum scratch
    xf = Bt * C * 2 * Kp * 4                  # forward spectrum value
    act = 2 * Bt * 2 * C * HW * 4             # y + pre live f32 temporaries
    return 2 * (xblk + oblk) + spec + xf + act


def _choose_batch_tile(B, C, HW, Kp, chip, const_mult, const_bytes):
    bt = max(1, min(B, pl.cdiv(chip["rows"], C)))      # fill the MXU M dimension
    bt = min(bt, max(1, pl.cdiv(B, chip["cores"])))    # >= one grid step per TensorCore
    budget = max(chip["vmem_cap"] - const_mult * const_bytes, 4 << 20)
    while bt > 1 and _step_vmem_bytes(bt, C, HW, Kp) > budget:
        bt = max(1, bt // 2)
    return bt


# ----------------------------------------------------------------------------------
# One-time lowering-time probe for single-buffered constants (pl.Buffered(1)).
# The real kernel runs with NO try/except; only this probe may fall back.
# ----------------------------------------------------------------------------------
_BUFFERED1_OK = None


def _buffered1_supported():
    global _BUFFERED1_OK
    if _BUFFERED1_OK is not None:
        return _BUFFERED1_OK
    try:
        spec = pl.BlockSpec((8, 128), lambda i: (0, 0), pipeline_mode=pl.Buffered(1))

        def _probe(x_ref, o_ref):
            o_ref[...] = x_ref[...] + 1.0

        fn = pl.pallas_call(
            _probe,
            out_shape=jax.ShapeDtypeStruct((8, 128), jnp.float32),
            grid=(1,),
            in_specs=[spec],
            out_specs=pl.BlockSpec((8, 128), lambda i: (0, 0)))
        jax.jit(fn).lower(jax.ShapeDtypeStruct((8, 128), jnp.float32))
        _BUFFERED1_OK = True
    except Exception:
        _BUFFERED1_OK = False
    return _BUFFERED1_OK


# ----------------------------------------------------------------------------------
# Jitted wrapper: weight packing + padding + pallas_call (bases passed in, pre-cached).
# ----------------------------------------------------------------------------------
@jax.jit
def _fno2d_core(x, fb, ib, w1c0, w2c0, cw0, cb0, w1c1, w2c1, cw1, cb1, w1w, w1b):
    B, C, H, W = x.shape
    HW = H * W
    Kp = fb.shape[1] // 2

    wre, wim = pack_spectral_weights(w1c0, w2c0, w1c1, w2c1, Kp)          # bf16 (C, 2C, Kp)
    cw01 = jnp.concatenate([cw0, cw1], axis=0).astype(jnp.bfloat16)       # (2C, C)
    cb01 = jnp.concatenate([cb0, cb1], axis=0).reshape(2 * C, 1).astype(jnp.float32)
    w1w_ = jnp.asarray(w1w, jnp.bfloat16)
    w1b_ = jnp.asarray(w1b, jnp.float32).reshape(C, 1)

    chip = _chip_params()
    use_buf1 = bool(_BUFFERED1_OK)
    const_mult = 1 if use_buf1 else 2
    cbytes = _const_bytes(C, HW, Kp)
    Bt = _choose_batch_tile(B, C, HW, Kp, chip, const_mult, cbytes)
    Bp = pl.cdiv(B, Bt) * Bt
    grid = (Bp // Bt,)

    x3 = x.reshape(B, C, HW).astype(jnp.float32)
    if Bp != B:
        x3 = jnp.pad(x3, ((0, Bp - B), (0, 0), (0, 0)))

    need = const_mult * cbytes + _step_vmem_bytes(Bt, C, HW, Kp)
    vmem_limit = int(min(chip["vmem_cap"], max(2 * need, 24 << 20)))

    matmul_flops = (2 * Bp * C * HW * 2 * Kp            # forward partial DFT
                    + 2 * Bp * 2 * C * 2 * Kp * HW      # inverse partial DFT (2 layers)
                    + 2 * Bp * 2 * C * C * HW           # fused conv0.con / conv1.con
                    + 2 * Bp * C * C * HW)              # self.w1
    mix_flops = 8 * Bp * C * 2 * C * Kp
    cost = pl.CostEstimate(flops=int(matmul_flops + mix_flops), transcendentals=0,
                           bytes_accessed=int(cbytes + 2 * Bp * C * HW * 4))

    def const_spec(shape):
        zeros = (0,) * len(shape)
        if use_buf1:
            return pl.BlockSpec(shape, lambda b: zeros, pipeline_mode=pl.Buffered(1))
        return pl.BlockSpec(shape, lambda b: zeros)

    in_specs = [
        pl.BlockSpec((Bt, C, HW), lambda b: (b, 0, 0)),           # x (batch tiled)
        const_spec(fb.shape), const_spec(ib.shape),               # DFT bases (bf16)
        const_spec(wre.shape), const_spec(wim.shape),             # spectral weights (bf16)
        const_spec(cw01.shape), const_spec(cb01.shape),           # fused 1x1 convs
        const_spec(w1w_.shape), const_spec(w1b_.shape),           # self.w1
    ]

    out = pl.pallas_call(
        fno2d_kernel,
        out_shape=jax.ShapeDtypeStruct((Bp, C, HW), jnp.float32),
        grid=grid,
        in_specs=in_specs,
        out_specs=pl.BlockSpec((Bt, C, HW), lambda b: (b, 0, 0)),
        scratch_shapes=[pltpu.VMEM((Bt * 2 * C, 2 * Kp), jnp.bfloat16)],
        compiler_params=pltpu.CompilerParams(
            dimension_semantics=("parallel",),
            vmem_limit_bytes=vmem_limit),
        cost_estimate=cost,
    )(x3, fb, ib, wre, wim, cw01, cb01, w1w_, w1b_)
    return out[:B].reshape(B, C, H, W)


def fno2d_pallas(x, m, w1c0, w2c0, cw0, cb0, w1c1, w2c1, cw1, cb1, w1w, w1b):
    B, C, H, W = x.shape
    K = 2 * m * m
    Kp = ((K + 127) // 128) * 128                       # lane-aligned re/im halves
    fb, ib = build_basis(H, W, m, Kp)                   # cached per (H, W, m, Kp)
    _buffered1_supported()                              # one-time probe (sets global)
    return _fno2d_core(x, fb, ib, w1c0, w2c0, cw0, cb0, w1c1, w2c1, cw1, cb1, w1w, w1b)


# ----------------------------------------------------------------------------------
# Pure-JAX reference (mirrors the PyTorch forward with jnp.fft) for validation.
# ----------------------------------------------------------------------------------
def fno2d_ref(x, m, w1c0, w2c0, cw0, cb0, w1c1, w2c1, cw1, cb1, w1w, w1b):
    def prelu(y):
        return jnp.where(y >= 0, y, 0.25 * y)

    def spectral_conv(xx, w1c, w2c, cw, cb):
        B, C, H, W = xx.shape
        x_ft = jnp.fft.rfft2(xx)
        out_ft = jnp.zeros((B, C, H, W // 2 + 1), dtype=x_ft.dtype)
        out_ft = out_ft.at[:, :, :m, :m].set(
            jnp.einsum('bixy,ioxy->boxy', x_ft[:, :, :m, :m], w1c))
        out_ft = out_ft.at[:, :, H - m:, :m].set(
            jnp.einsum('bixy,ioxy->boxy', x_ft[:, :, H - m:, :m], w2c))
        y = jnp.fft.irfft2(out_ft, s=(H, W))
        pre = jnp.einsum('oi,bihw->bohw', cw, xx) + cb[None, :, None, None]
        return prelu(y + pre)

    y0 = spectral_conv(x, w1c0, w2c0, cw0, cb0)
    x3 = y0 + x
    y1 = spectral_conv(x, w1c1, w2c1, cw1, cb1)
    x4 = y1 + x3
    x4 = jnp.einsum('oi,bihw->bohw', w1w, x4) + w1b[None, :, None, None]
    return x4 + x


# ----------------------------------------------------------------------------------
if __name__ == "__main__":
    # NOTE: the original FNO2d.__init__ references undefined self.modes / self.width;
    # interpreted as `modes` and `in_clannes`.  Unused submodules (w0,w2,w3,conv2,conv3,
    # fc1,fc2) are never touched by forward() and are not instantiated.  nn.PReLU() is
    # constructed fresh inside forward(), so alpha is always its default 0.25.
    B, C, H, W, m = 2, 4, 16, 16, 2

    key = jax.random.PRNGKey(0)
    ks = jax.random.split(key, 12)
    scale = 1.0 / (C * C)

    def cweights(k):
        ka, kb = jax.random.split(k)
        return (scale * jax.random.uniform(ka, (C, C, m, m))
                + 1j * scale * jax.random.uniform(kb, (C, C, m, m))).astype(jnp.complex64)

    w1c0, w2c0 = cweights(ks[0]), cweights(ks[1])     # conv0.weights1 / weights2
    w1c1, w2c1 = cweights(ks[2]), cweights(ks[3])     # conv1.weights1 / weights2
    bound = 1.0 / np.sqrt(C)
    uni = lambda k, shape: jax.random.uniform(k, shape, jnp.float32, -bound, bound)
    cw0, cb0 = uni(ks[4], (C, C)), uni(ks[5], (C,))   # conv0.con (1x1 conv)
    cw1, cb1 = uni(ks[6], (C, C)), uni(ks[7], (C,))   # conv1.con (1x1 conv)
    w1w, w1b = uni(ks[8], (C, C)), uni(ks[9], (C,))   # self.w1   (1x1 conv)

    x = jax.random.normal(ks[10], (B, C, H, W), jnp.float32)

    out = fno2d_pallas(x, m, w1c0, w2c0, cw0, cb0, w1c1, w2c1, cw1, cb1, w1w, w1b)
    out = jax.block_until_ready(out)

    ref = fno2d_ref(x, m, w1c0, w2c0, cw0, cb0, w1c1, w2c1, cw1, cb1, w1w, w1b)
    np.testing.assert_allclose(np.asarray(out), np.asarray(ref), rtol=2e-2, atol=2e-2)
    print("KERNEL_OK")
</pallas_src>

<mosaic_0001>
module attributes {stable_mosaic.version = 11 : i64} {
  func.func @fno2d_kernel(%arg0: i32, %arg1: memref<1x4x256xf32, #tpu.memory_space<vmem>>, %arg2: memref<256x256xbf16, #tpu.memory_space<vmem>>, %arg3: memref<256x256xbf16, #tpu.memory_space<vmem>>, %arg4: memref<4x8x128xbf16, #tpu.memory_space<vmem>>, %arg5: memref<4x8x128xbf16, #tpu.memory_space<vmem>>, %arg6: memref<8x4xbf16, #tpu.memory_space<vmem>>, %arg7: memref<8x1xf32, #tpu.memory_space<vmem>>, %arg8: memref<4x4xbf16, #tpu.memory_space<vmem>>, %arg9: memref<4x1xf32, #tpu.memory_space<vmem>>, %arg10: memref<1x4x256xf32, #tpu.memory_space<vmem>>, %arg11: memref<8x256xbf16, #tpu.memory_space<vmem>>) attributes {dimension_semantics = [#tpu.dimension_semantics<parallel>], iteration_bounds = array<i64: 2>, scalar_prefetch = 0 : i64, scratch_operands = 1 : i64, tpu.core_type = #tpu.core_type<tc>, window_params = [{transform_indices = @transform_0, window_bounds = array<i64: 1, 4, 256>}, {pipeline_mode = #tpu.pipeline_mode<synchronous>, transform_indices = @transform_1, window_bounds = array<i64: 256, 256>}, {pipeline_mode = #tpu.pipeline_mode<synchronous>, transform_indices = @transform_2, window_bounds = array<i64: 256, 256>}, {pipeline_mode = #tpu.pipeline_mode<synchronous>, transform_indices = @transform_3, window_bounds = array<i64: 4, 8, 128>}, {pipeline_mode = #tpu.pipeline_mode<synchronous>, transform_indices = @transform_4, window_bounds = array<i64: 4, 8, 128>}, {pipeline_mode = #tpu.pipeline_mode<synchronous>, transform_indices = @transform_5, window_bounds = array<i64: 8, 4>}, {pipeline_mode = #tpu.pipeline_mode<synchronous>, transform_indices = @transform_6, window_bounds = array<i64: 8, 1>}, {pipeline_mode = #tpu.pipeline_mode<synchronous>, transform_indices = @transform_7, window_bounds = array<i64: 4, 4>}, {pipeline_mode = #tpu.pipeline_mode<synchronous>, transform_indices = @transform_8, window_bounds = array<i64: 4, 1>}, {transform_indices = @transform_9, window_bounds = array<i64: 1, 4, 256>}]} {
    %c0 = arith.constant 0 : index
    %c0_0 = arith.constant 0 : index
    %c0_1 = arith.constant 0 : index
    %0 = vector.load %arg1[%c0, %c0_0, %c0_1] : memref<1x4x256xf32, #tpu.memory_space<vmem>>, vector<1x4x256xf32>
    %1 = arith.truncf %0 : vector<1x4x256xf32> to vector<1x4x256xbf16>
    %2 = vector.shape_cast %1 : vector<1x4x256xbf16> to vector<4x256xbf16>
    %c0_2 = arith.constant 0 : index
    %c0_3 = arith.constant 0 : index
    %3 = vector.load %arg2[%c0_2, %c0_3] : memref<256x256xbf16, #tpu.memory_space<vmem>>, vector<256x256xbf16>
    %cst = arith.constant dense<0.000000e+00> : vector<4x256xf32>
    %4 = tpu.matmul %2, %3, %cst {dimension_numbers = #tpu.dot_dimension_numbers<[1], [0], [0], [1], [0, 0, 1, 1], [], []>} : vector<4x256xbf16>, vector<256x256xbf16>, vector<4x256xf32> -> vector<4x256xf32>
    %5 = vector.shape_cast %4 : vector<4x256xf32> to vector<1x4x256xf32>
    %cst_4 = arith.constant 0.000000e+00 : f32
    %6 = vector.broadcast %cst_4 : f32 to vector<1x8x128xf32>
    %cst_5 = arith.constant 0.000000e+00 : f32
    %7 = vector.broadcast %cst_5 : f32 to vector<1x8x128xf32>
    %8 = vector.extract_strided_slice %5 {offsets = [0, 0, 0], sizes = [1, 1, 128], strides = [1, 1, 1]} : vector<1x4x256xf32> to vector<1x1x128xf32>
    %9 = vector.extract_strided_slice %5 {offsets = [0, 0, 128], sizes = [1, 1, 128], strides = [1, 1, 1]} : vector<1x4x256xf32> to vector<1x1x128xf32>
    %c0_6 = arith.constant 0 : index
    %c0_7 = arith.constant 0 : index
    %c0_8 = arith.constant 0 : index
    %10 = vector.load %arg4[%c0_6, %c0_7, %c0_8] : memref<4x8x128xbf16, #tpu.memory_space<vmem>>, vector<1x8x128xbf16>
    %11 = arith.extf %10 : vector<1x8x128xbf16> to vector<1x8x128xf32>
    %c0_9 = arith.constant 0 : index
    %c0_10 = arith.constant 0 : index
    %c0_11 = arith.constant 0 : index
    %12 = vector.load %arg5[%c0_9, %c0_10, %c0_11] : memref<4x8x128xbf16, #tpu.memory_space<vmem>>, vector<1x8x128xbf16>
    %13 = arith.extf %12 : vector<1x8x128xbf16> to vector<1x8x128xf32>
    %14 = vector.broadcast %8 : vector<1x1x128xf32> to vector<1x8x128xf32>
    %15 = arith.mulf %14, %11 : vector<1x8x128xf32>
    %16 = arith.addf %6, %15 : vector<1x8x128xf32>
    %17 = vector.broadcast %9 : vector<1x1x128xf32> to vector<1x8x128xf32>
    %18 = arith.mulf %17, %13 : vector<1x8x128xf32>
    %19 = arith.subf %16, %18 : vector<1x8x128xf32>
    %20 = vector.broadcast %8 : vector<1x1x128xf32> to vector<1x8x128xf32>
    %21 = arith.mulf %20, %13 : vector<1x8x128xf32>
    %22 = arith.addf %7, %21 : vector<1x8x128xf32>
    %23 = vector.broadcast %9 : vector<1x1x128xf32> to vector<1x8x128xf32>
    %24 = arith.mulf %23, %11 : vector<1x8x128xf32>
    %25 = arith.addf %22, %24 : vector<1x8x128xf32>
    %26 = vector.extract_strided_slice %5 {offsets = [0, 1, 0], sizes = [1, 1, 128], strides = [1, 1, 1]} : vector<1x4x256xf32> to vector<1x1x128xf32>
    %27 = vector.extract_strided_slice %5 {offsets = [0, 1, 128], sizes = [1, 1, 128], strides = [1, 1, 1]} : vector<1x4x256xf32> to vector<1x1x128xf32>
    %c1 = arith.constant 1 : index
    %c0_12 = arith.constant 0 : index
    %c0_13 = arith.constant 0 : index
    %28 = vector.load %arg4[%c1, %c0_12, %c0_13] : memref<4x8x128xbf16, #tpu.memory_space<vmem>>, vector<1x8x128xbf16>
    %29 = arith.extf %28 : vector<1x8x128xbf16> to vector<1x8x128xf32>
    %c1_14 = arith.constant 1 : index
    %c0_15 = arith.constant 0 : index
    %c0_16 = arith.constant 0 : index
    %30 = vector.load %arg5[%c1_14, %c0_15, %c0_16] : memref<4x8x128xbf16, #tpu.memory_space<vmem>>, vector<1x8x128xbf16>
    %31 = arith.extf %30 : vector<1x8x128xbf16> to vector<1x8x128xf32>
    %32 = vector.broadcast %26 : vector<1x1x128xf32> to vector<1x8x128xf32>
    %33 = arith.mulf %32, %29 : vector<1x8x128xf32>
    %34 = arith.addf %19, %33 : vector<1x8x128xf32>
    %35 = vector.broadcast %27 : vector<1x1x128xf32> to vector<1x8x128xf32>
    %36 = arith.mulf %35, %31 : vector<1x8x128xf32>
    %37 = arith.subf %34, %36 : vector<1x8x128xf32>
    %38 = vector.broadcast %26 : vector<1x1x128xf32> to vector<1x8x128xf32>
    %39 = arith.mulf %38, %31 : vector<1x8x128xf32>
    %40 = arith.addf %25, %39 : vector<1x8x128xf32>
    %41 = vector.broadcast %27 : vector<1x1x128xf32> to vector<1x8x128xf32>
    %42 = arith.mulf %41, %29 : vector<1x8x128xf32>
    %43 = arith.addf %40, %42 : vector<1x8x128xf32>
    %44 = vector.extract_strided_slice %5 {offsets = [0, 2, 0], sizes = [1, 1, 128], strides = [1, 1, 1]} : vector<1x4x256xf32> to vector<1x1x128xf32>
    %45 = vector.extract_strided_slice %5 {offsets = [0, 2, 128], sizes = [1, 1, 128], strides = [1, 1, 1]} : vector<1x4x256xf32> to vector<1x1x128xf32>
    %c2 = arith.constant 2 : index
    %c0_17 = arith.constant 0 : index
    %c0_18 = arith.constant 0 : index
    %46 = vector.load %arg4[%c2, %c0_17, %c0_18] : memref<4x8x128xbf16, #tpu.memory_space<vmem>>, vector<1x8x128xbf16>
    %47 = arith.extf %46 : vector<1x8x128xbf16> to vector<1x8x128xf32>
    %c2_19 = arith.constant 2 : index
    %c0_20 = arith.constant 0 : index
    %c0_21 = arith.constant 0 : index
    %48 = vector.load %arg5[%c2_19, %c0_20, %c0_21] : memref<4x8x128xbf16, #tpu.memory_space<vmem>>, vector<1x8x128xbf16>
    %49 = arith.extf %48 : vector<1x8x128xbf16> to vector<1x8x128xf32>
    %50 = vector.broadcast %44 : vector<1x1x128xf32> to vector<1x8x128xf32>
    %51 = arith.mulf %50, %47 : vector<1x8x128xf32>
    %52 = arith.addf %37, %51 : vector<1x8x128xf32>
    %53 = vector.broadcast %45 : vector<1x1x128xf32> to vector<1x8x128xf32>
    %54 = arith.mulf %53, %49 : vector<1x8x128xf32>
    %55 = arith.subf %52, %54 : vector<1x8x128xf32>
    %56 = vector.broadcast %44 : vector<1x1x128xf32> to vector<1x8x128xf32>
    %57 = arith.mulf %56, %49 : vector<1x8x128xf32>
    %58 = arith.addf %43, %57 : vector<1x8x128xf32>
    %59 = vector.broadcast %45 : vector<1x1x128xf32> to vector<1x8x128xf32>
    %60 = arith.mulf %59, %47 : vector<1x8x128xf32>
    %61 = arith.addf %58, %60 : vector<1x8x128xf32>
    %62 = vector.extract_strided_slice %5 {offsets = [0, 3, 0], sizes = [1, 1, 128], strides = [1, 1, 1]} : vector<1x4x256xf32> to vector<1x1x128xf32>
    %63 = vector.extract_strided_slice %5 {offsets = [0, 3, 128], sizes = [1, 1, 128], strides = [1, 1, 1]} : vector<1x4x256xf32> to vector<1x1x128xf32>
    %c3 = arith.constant 3 : index
    %c0_22 = arith.constant 0 : index
    %c0_23 = arith.constant 0 : index
    %64 = vector.load %arg4[%c3, %c0_22, %c0_23] : memref<4x8x128xbf16, #tpu.memory_space<vmem>>, vector<1x8x128xbf16>
    %65 = arith.extf %64 : vector<1x8x128xbf16> to vector<1x8x128xf32>
    %c3_24 = arith.constant 3 : index
    %c0_25 = arith.constant 0 : index
    %c0_26 = arith.constant 0 : index
    %66 = vector.load %arg5[%c3_24, %c0_25, %c0_26] : memref<4x8x128xbf16, #tpu.memory_space<vmem>>, vector<1x8x128xbf16>
    %67 = arith.extf %66 : vector<1x8x128xbf16> to vector<1x8x128xf32>
    %68 = vector.broadcast %62 : vector<1x1x128xf32> to vector<1x8x128xf32>
    %69 = arith.mulf %68, %65 : vector<1x8x128xf32>
    %70 = arith.addf %55, %69 : vector<1x8x128xf32>
    %71 = vector.broadcast %63 : vector<1x1x128xf32> to vector<1x8x128xf32>
    %72 = arith.mulf %71, %67 : vector<1x8x128xf32>
    %73 = arith.subf %70, %72 : vector<1x8x128xf32>
    %74 = vector.broadcast %62 : vector<1x1x128xf32> to vector<1x8x128xf32>
    %75 = arith.mulf %74, %67 : vector<1x8x128xf32>
    %76 = arith.addf %61, %75 : vector<1x8x128xf32>
    %77 = vector.broadcast %63 : vector<1x1x128xf32> to vector<1x8x128xf32>
    %78 = arith.mulf %77, %65 : vector<1x8x128xf32>
    %79 = arith.addf %76, %78 : vector<1x8x128xf32>
    %80 = vector.shape_cast %73 : vector<1x8x128xf32> to vector<8x128xf32>
    %81 = arith.truncf %80 : vector<8x128xf32> to vector<8x128xbf16>
    %c0_27 = arith.constant 0 : index
    %c0_28 = arith.constant 0 : index
    %82 = vector.load %arg11[%c0_27, %c0_28] : memref<8x256xbf16, #tpu.memory_space<vmem>>, vector<8x128xbf16>
    tpu.vector_store %arg11[%c0_27, %c0_28], %81 {strides = array<i32>} : memref<8x256xbf16, #tpu.memory_space<vmem>>, vector<8x128xbf16>,
    %83 = vector.shape_cast %79 : vector<1x8x128xf32> to vector<8x128xf32>
    %84 = arith.truncf %83 : vector<8x128xf32> to vector<8x128xbf16>
    %c0_29 = arith.constant 0 : index
    %c128 = arith.constant 128 : index
    %85 = vector.load %arg11[%c0_29, %c128] : memref<8x256xbf16, #tpu.memory_space<vmem>>, vector<8x128xbf16>
    tpu.vector_store %arg11[%c0_29, %c128], %84 {strides = array<i32>} : memref<8x256xbf16, #tpu.memory_space<vmem>>, vector<8x128xbf16>,
    %c0_30 = arith.constant 0 : index
    %c0_31 = arith.constant 0 : index
    %86 = vector.load %arg11[%c0_30, %c0_31] : memref<8x256xbf16, #tpu.memory_space<vmem>>, vector<8x256xbf16>
    %c0_32 = arith.constant 0 : index
    %c0_33 = arith.constant 0 : index
    %87 = vector.load %arg3[%c0_32, %c0_33] : memref<256x256xbf16, #tpu.memory_space<vmem>>, vector<256x256xbf16>
    %cst_34 = arith.constant dense<0.000000e+00> : vector<8x256xf32>
    %88 = tpu.matmul %86, %87, %cst_34 {dimension_numbers = #tpu.dot_dimension_numbers<[1], [0], [0], [1], [0, 0, 1, 1], [], []>} : vector<8x256xbf16>, vector<256x256xbf16>, vector<8x256xf32> -> vector<8x256xf32>
    %89 = vector.shape_cast %88 : vector<8x256xf32> to vector<1x8x256xf32>
    %c0_35 = arith.constant 0 : index
    %c0_36 = arith.constant 0 : index
    %90 = vector.load %arg6[%c0_35, %c0_36] : memref<8x4xbf16, #tpu.memory_space<vmem>>, vector<8x4xbf16>
    %91 = vector.shape_cast %90 : vector<8x4xbf16> to vector<1x8x4xbf16>
    "tpu.trace_start"() <{level = 10 : i32, message = "boi,bik->bok"}> : () -> ()
    %cst_37 = arith.constant dense<0.000000e+00> : vector<1x8x256xf32>
    %92 = tpu.matmul %91, %1, %cst_37 {dimension_numbers = #tpu.dot_dimension_numbers<[2], [1], [1], [2], [0, 0, 0, 1, 1, 2], [0], [0]>} : vector<1x8x4xbf16>, vector<1x4x256xbf16>, vector<1x8x256xf32> -> vector<1x8x256xf32>
    "tpu.trace_stop"() : () -> ()
    %c0_38 = arith.constant 0 : index
    %c0_39 = arith.constant 0 : index
    %93 = vector.load %arg7[%c0_38, %c0_39] : memref<8x1xf32, #tpu.memory_space<vmem>>, vector<8x1xf32>
    %94 = vector.shape_cast %93 : vector<8x1xf32> to vector<1x8x1xf32>
    %95 = vector.broadcast %94 : vector<1x8x1xf32> to vector<1x8x256xf32>
    %96 = arith.addf %92, %95 : vector<1x8x256xf32>
    %97 = arith.addf %89, %96 : vector<1x8x256xf32>
    %cst_40 = arith.constant 0.000000e+00 : f32
    %98 = vector.broadcast %cst_40 : f32 to vector<1x8x256xf32>
    %99 = arith.cmpf oge, %97, %98 : vector<1x8x256xf32>
    %cst_41 = arith.constant 2.500000e-01 : f32
    %100 = vector.broadcast %cst_41 : f32 to vector<1x8x256xf32>
    %101 = arith.mulf %100, %97 : vector<1x8x256xf32>
    %102 = arith.select %99, %97, %101 : vector<1x8x256xi1>, vector<1x8x256xf32>
    %103 = vector.extract_strided_slice %102 {offsets = [0, 0, 0], sizes = [1, 4, 256], strides = [1, 1, 1]} : vector<1x8x256xf32> to vector<1x4x256xf32>
    %104 = vector.extract_strided_slice %102 {offsets = [0, 4, 0], sizes = [1, 4, 256], strides = [1, 1, 1]} : vector<1x8x256xf32> to vector<1x4x256xf32>
    %105 = arith.addf %103, %104 : vector<1x4x256xf32>
    %106 = arith.addf %105, %0 : vector<1x4x256xf32>
    %c0_42 = arith.constant 0 : index
    %c0_43 = arith.constant 0 : index
    %107 = vector.load %arg8[%c0_42, %c0_43] : memref<4x4xbf16, #tpu.memory_space<vmem>>, vector<4x4xbf16>
    %108 = vector.shape_cast %107 : vector<4x4xbf16> to vector<1x4x4xbf16>
    %109 = arith.truncf %106 : vector<1x4x256xf32> to vector<1x4x256xbf16>
    "tpu.trace_start"() <{level = 10 : i32, message = "boi,bik->bok"}> : () -> ()
    %cst_44 = arith.constant dense<0.000000e+00> : vector<1x4x256xf32>
    %110 = tpu.matmul %108, %109, %cst_44 {dimension_numbers = #tpu.dot_dimension_numbers<[2], [1], [1], [2], [0, 0, 0, 1, 1, 2], [0], [0]>} : vector<1x4x4xbf16>, vector<1x4x256xbf16>, vector<1x4x256xf32> -> vector<1x4x256xf32>
    "tpu.trace_stop"() : () -> ()
    %c0_45 = arith.constant 0 : index
    %c0_46 = arith.constant 0 : index
    %111 = vector.load %arg9[%c0_45, %c0_46] : memref<4x1xf32, #tpu.memory_space<vmem>>, vector<4x1xf32>
    %112 = vector.shape_cast %111 : vector<4x1xf32> to vector<1x4x1xf32>
    %113 = vector.broadcast %112 : vector<1x4x1xf32> to vector<1x4x256xf32>
    %114 = arith.addf %110, %113 : vector<1x4x256xf32>
    %115 = arith.addf %114, %0 : vector<1x4x256xf32>
    %c0_47 = arith.constant 0 : index
    %c0_48 = arith.constant 0 : index
    %c0_49 = arith.constant 0 : index
    %116 = vector.load %arg10[%c0_47, %c0_48, %c0_49] : memref<1x4x256xf32, #tpu.memory_space<vmem>>, vector<1x4x256xf32>
    tpu.vector_store %arg10[%c0_47, %c0_48, %c0_49], %115 {strides = array<i32>} : memref<1x4x256xf32, #tpu.memory_space<vmem>>, vector<1x4x256xf32>,
    return
  }
  func.func @transform_0(%arg0: i32) -> (i32, i32, i32) {
    %c0_i32 = arith.constant 0 : i32
    %c0_i32_0 = arith.constant 0 : i32
    %c0_i32_1 = arith.constant 0 : i32
    return %arg0, %c0_i32, %c0_i32_0 : i32, i32, i32
  }
  func.func @transform_1(%arg0: i32) -> (i32, i32) {
    %c0_i32 = arith.constant 0 : i32
    %c0_i32_0 = arith.constant 0 : i32
    %c0_i32_1 = arith.constant 0 : i32
    return %c0_i32, %c0_i32_0 : i32, i32
  }
  func.func @transform_2(%arg0: i32) -> (i32, i32) {
    %c0_i32 = arith.constant 0 : i32
    %c0_i32_0 = arith.constant 0 : i32
    %c0_i32_1 = arith.constant 0 : i32
    return %c0_i32, %c0_i32_0 : i32, i32
  }
  func.func @transform_3(%arg0: i32) -> (i32, i32, i32) {
    %c0_i32 = arith.constant 0 : i32
    %c0_i32_0 = arith.constant 0 : i32
    %c0_i32_1 = arith.constant 0 : i32
    %c0_i32_2 = arith.constant 0 : i32
    return %c0_i32, %c0_i32_0, %c0_i32_1 : i32, i32, i32
  }
  func.func @transform_4(%arg0: i32) -> (i32, i32, i32) {
    %c0_i32 = arith.constant 0 : i32
    %c0_i32_0 = arith.constant 0 : i32
    %c0_i32_1 = arith.constant 0 : i32
    %c0_i32_2 = arith.constant 0 : i32
    return %c0_i32, %c0_i32_0, %c0_i32_1 : i32, i32, i32
  }
  func.func @transform_5(%arg0: i32) -> (i32, i32) {
    %c0_i32 = arith.constant 0 : i32
    %c0_i32_0 = arith.constant 0 : i32
    %c0_i32_1 = arith.constant 0 : i32
    return %c0_i32, %c0_i32_0 : i32, i32
  }
  func.func @transform_6(%arg0: i32) -> (i32, i32) {
    %c0_i32 = arith.constant 0 : i32
    %c0_i32_0 = arith.constant 0 : i32
    %c0_i32_1 = arith.constant 0 : i32
    return %c0_i32, %c0_i32_0 : i32, i32
  }
  func.func @transform_7(%arg0: i32) -> (i32, i32) {
    %c0_i32 = arith.constant 0 : i32
    %c0_i32_0 = arith.constant 0 : i32
    %c0_i32_1 = arith.constant 0 : i32
    return %c0_i32, %c0_i32_0 : i32, i32
  }
  func.func @transform_8(%arg0: i32) -> (i32, i32) {
    %c0_i32 = arith.constant 0 : i32
    %c0_i32_0 = arith.constant 0 : i32
    %c0_i32_1 = arith.constant 0 : i32
    return %c0_i32, %c0_i32_0 : i32, i32
  }
  func.func @transform_9(%arg0: i32) -> (i32, i32, i32) {
    %c0_i32 = arith.constant 0 : i32
    %c0_i32_0 = arith.constant 0 : i32
    %c0_i32_1 = arith.constant 0 : i32
    return %arg0, %c0_i32, %c0_i32_0 : i32, i32, i32
  }
}

</mosaic_0001>

<bundles_post_ra>
// kernel: custom-call.1
= control target key start
LH: loop header
LB: loop body
LE: loop exit
PB: predicated region body
PF: predicated region fallthrough
CT: control target
= control target key end

     0   :  { %s59_s0 = inlined_call_operand.hbm [shape: c64[4,4,2,2], index: 0, kind: input, shape index: {}]   ;;  %s60_s1 = inlined_call_operand.vmem [shape: f32[4,4,2,2], index: 1, kind: output, shape index: {}]  }
   0x1   :  { %s2_s8 = scalar_lea.hbm %s59_s0, 256 }
   0x2   :  { %3 = vsyncpa [#allocation0], 0  ;;  %s4_s11 = sshll.u32 %s60_s1, 4  ;;  %s34_s14 = scalar_lea.hbm %s59_s0, 512  ;;  %s5_s11 = int_to_ptr.vmem [resolvable:$true] %s4_s11 }
   0x3   :  { %p11_p0 = scmp.ne.s32.totalorder %s2_s8, %s34_s14  ;;  %p13_p1 = scmp.lt.u32.totalorder %s2_s8, %s59_s0 }
   0x4   :  { %p14_p2 = scmp.lt.u32.totalorder %s34_s14, %s34_s14  ;;  %p16_p4 = scmp.lt.u32.totalorder %s34_s14, %s2_s8 }
   0x6   :  { %p15_p3 = por %p14_p2, %p13_p1 }
   0x8   :  { %p17_p5 = por %p16_p4, %p15_p3 }
   0xa   :  { %p18_p6 = pnand %p17_p5, %p11_p0 }
   0xc   :  { %21 = shalt.err (!%p18_p6)  }
   0xd   :  { %s22_s17 = scalar_lea.vmem %s5_s11, 256  ;;  %p27_p8 = scmp.lt.s32.totalorder %s5_s11, %s5_s11 }
   0xe   :  { %p23_p7 = scmp.ne.s32.totalorder %s5_s11, %s22_s17  ;;  %p28_p9 = scmp.lt.s32.totalorder %s22_s17, %s22_s17 }
  0x10   :  { %p29_p10 = por %p28_p9, %p27_p8 }
  0x12   :  { %p30_p11 = pnand %p29_p10, %p23_p7 }
  0x14   :  { %33 = shalt.err (!%p30_p11)  }
  0x15   :  { %7 = dma.hbm_to_vmem [thread:$0]  %s2_s8, 256, %s5_s11, [#allocation0] }
  0x16   :  { %35 = dma.done.wait [#allocation0], 256  }
  0x17   :  { %36 = vsyncadd [#allocation0], 4294967040 }
  0x18   :  { %9 = vsyncpa [#allocation0], 1 }

// kernel: custom-call
= control target key start
LH: loop header
LB: loop body
LE: loop exit
PB: predicated region body
PF: predicated region fallthrough
CT: control target
= control target key end

     0   :  { %2 = vsyncpa [#allocation0], 0  ;;  %s61_s0 = inlined_call_operand.hbm [shape: c64[4,4,2,2], index: 0, kind: input, shape index: {}]   ;;  %s62_s1 = inlined_call_operand.vmem [shape: f32[4,4,2,2], index: 1, kind: output, shape index: {}]  }
   0x1   :  { %s3_s8 = sshll.u32 %s62_s1, 4  ;;  %s9_s11 = scalar_lea.hbm %s61_s0, 256  ;;  %s4_s8 = int_to_ptr.vmem [resolvable:$true] %s3_s8 }
   0x2   :  { %p10_p0 = scmp.ne.s32.totalorder %s61_s0, %s9_s11  ;;  %s11_s16 = scalar_lea.hbm %s61_s0, 512 }
   0x3   :  { %p12_p1 = scmp.lt.u32.totalorder %s11_s16, %s9_s11  ;;  %p13_p2 = scmp.lt.u32.totalorder %s9_s11, %s61_s0 }
   0x5   :  { %p14_p3 = por %p13_p2, %p12_p1 }
   0x7   :  { %p15_p4 = pnand %p14_p3, %p10_p0 }
   0x9   :  { %18 = shalt.err (!%p15_p4)  }
   0xa   :  { %s19_s1 = scalar_lea.vmem %s4_s8, 256  ;;  %p24_p6 = scmp.lt.s32.totalorder %s4_s8, %s4_s8 }
   0xb   :  { %p20_p5 = scmp.ne.s32.totalorder %s4_s8, %s19_s1  ;;  %p25_p7 = scmp.lt.s32.totalorder %s19_s1, %s19_s1 }
   0xd   :  { %p26_p8 = por %p25_p7, %p24_p6 }
   0xf   :  { %p27_p9 = pnand %p26_p8, %p20_p5 }
  0x11   :  { %30 = shalt.err (!%p27_p9)  }
  0x12   :  { %6 = dma.hbm_to_vmem [thread:$0]  %s61_s0, 256, %s4_s8, [#allocation0] }
  0x13   :  { %31 = dma.done.wait [#allocation0], 256  }
  0x14   :  { %32 = vsyncadd [#allocation0], 4294967040 }
  0x15   :  { %8 = vsyncpa [#allocation0], 1 }

// kernel: _fno2d_core.1
= control target key start
LH: loop header
LB: loop body
LE: loop exit
PB: predicated region body
PF: predicated region fallthrough
CT: control target
= control target key end

     0   :  { %s1370_s30 = smov 0   ;;  %s1641_s0 = inlined_call_operand.vmem [shape: f32[2,4,256], index: 0, kind: input, shape index: {}]   ;;  %s1642_s1 = inlined_call_operand.vmem [shape: bf16[256,256], index: 1, kind: input, shape index: {}]   ;;  %s1643_s2 = inlined_call_operand.vmem [shape: bf16[256,256], index: 2, kind: input, shape index: {}]   ;;  %s1644_s3 = inlined_call_operand.vmem [shape: bf16[4,8,128], index: 3, kind: input, shape index: {}]   ;;  %s1645_s4 = inlined_call_operand.vmem [shape: bf16[4,8,128], index: 4, kind: input, shape index: {}]   ;;  %s1646_s5 = inlined_call_operand.vmem [shape: bf16[8,4], index: 5, kind: input, shape index: {}]   ;;  %s1647_s6 = inlined_call_operand.vmem [shape: f32[8,1], index: 6, kind: input, shape index: {}]   ;;  %s1648_s7 = inlined_call_operand.vmem [shape: bf16[4,4], index: 7, kind: input, shape index: {}]   ;;  %s1649_s8 = inlined_call_operand.vmem [shape: f32[4,1], index: 8, kind: input, shape index: {}]   ;;  %s1650_s9 = inlined_call_operand.vmem [shape: f32[2,4,256], index: 9, kind: output, shape index: {}]  }
   0x1 LB: > { %s1102_s10 = sadd.s32 4294967295, %s1317_s30   ;;  %p1106_p0 = scmp.ge.s32.totalorder %s1317_s30, 1  ;;  %s1317_s30 = sphi %s1370_s30, %s19_s30  }
   0x2   : > { %p287_p1 = scmp.lt.s32.totalorder %s1317_s30, 3 }
   0x4   : > { %p288_p2 = pnand %p1106_p0, %p287_p1 }
   0x5   : > { %v1214_v0 = vld [vmem:[%s1642_s1 + $0x4] ss:$8 sps:$4 sm:$0xff] (!%p288_p2)   ;;  %v1216_v1 = vld [vmem:[%s1642_s1] ss:$8 sps:$4 sm:$0xff] (!%p288_p2)   ;;  %v1217_v2 = vld [vmem:[%s1642_s1 + $0x14] ss:$8 sps:$4 sm:$0xff] (!%p288_p2)  }
   0x6   : > { %291 = sbr.rel (%p288_p2) target bundleno = 766 (0x2fe), region = 56  ;;  %532 = vmatprep.subr.bf16.mxu0 (!%p288_p2), %v1214_v0  ;;  %v1219_v3 = vld [vmem:[%s1642_s1 + $0x10] ss:$8 sps:$4 sm:$0xff] (!%p288_p2)   ;;  %v1220_v4 = vld [vmem:[%s1642_s1 + $0x24] ss:$8 sps:$4 sm:$0xff] (!%p288_p2)   ;;  %p323_p3 = scmp.lt.s32.totalorder (!%p288_p2), %s1102_s10, 1 }
   0x7   : > { %533 = vmatpush1.bf16.msra.mxu0 (!%p288_p2), %v1216_v1  ;;  %v1222_v5 = vld [vmem:[%s1642_s1 + $0x20] ss:$8 sps:$4 sm:$0xff] (!%p288_p2)   ;;  %v1223_v6 = vld [vmem:[%s1642_s1 + $0x34] ss:$8 sps:$4 sm:$0xff] (!%p288_p2)   ;;  %v1225_v7 = vld [vmem:[%s1642_s1 + $0x30] ss:$8 sps:$4 sm:$0xff] (!%p288_p2)  }
   0x8   : > { %534 = vmatprep.subr.bf16.mxu0 (!%p288_p2), %v1217_v2  ;;  %v1226_v8 = vld [vmem:[%s1642_s1 + $0x44] ss:$8 sps:$4 sm:$0xff] (!%p288_p2)   ;;  %v1228_v9 = vld [vmem:[%s1642_s1 + $0x40] ss:$8 sps:$4 sm:$0xff] (!%p288_p2)   ;;  %v1229_v10 = vld [vmem:[%s1642_s1 + $0x54] ss:$8 sps:$4 sm:$0xff] (!%p288_p2)  }
   0x9   : > { %v1231_v11 = vld [vmem:[%s1642_s1 + $0x50] ss:$8 sps:$4 sm:$0xff] (!%p288_p2)   ;;  %v1232_v12 = vld [vmem:[%s1642_s1 + $0x64] ss:$8 sps:$4 sm:$0xff] (!%p288_p2)   ;;  %v1234_v13 = vld [vmem:[%s1642_s1 + $0x60] ss:$8 sps:$4 sm:$0xff] (!%p288_p2)  }
   0xa   : > { %v1263_v16 = vld [vmem:[%s1643_s2 + $0x4] ss:$8 sps:$4 sm:$0xff] (!%p288_p2)   ;;  %v1265_v17 = vld [vmem:[%s1643_s2] ss:$8 sps:$4 sm:$0xff] (!%p288_p2)   ;;  %v1266_v18 = vld [vmem:[%s1643_s2 + $0x14] ss:$8 sps:$4 sm:$0xff] (!%p288_p2)  }
   0xb   : > { %535 = vmatpush1.bf16.msra.mxu0 (!%p288_p2), %v1219_v3  ;;  %v1235_v19 = vld [vmem:[%s1642_s1 + $0x74] ss:$8 sps:$4 sm:$0xff] (!%p288_p2)   ;;  %863 = vmatprep.subr.bf16.mxu1 (!%p288_p2), %v1263_v16  ;;  %v1268_v21 = vld [vmem:[%s1643_s2 + $0x10] ss:$8 sps:$4 sm:$0xff] (!%p288_p2)   ;;  %v1269_v22 = vld [vmem:[%s1643_s2 + $0x24] ss:$8 sps:$4 sm:$0xff] (!%p288_p2)  }
   0xc   : > { %536 = vmatprep.subr.bf16.mxu0 (!%p288_p2), %v1220_v4  ;;  %864 = vmatpush1.bf16.msra.mxu1 (!%p288_p2), %v1265_v17  ;;  %v1237_v23 = vld [vmem:[%s1642_s1 + $0x70] ss:$8 sps:$4 sm:$0xff] (!%p288_p2)   ;;  %v1238_v24 = vld [vmem:[%s1642_s1 + $0x84] ss:$8 sps:$4 sm:$0xff] (!%p288_p2)   ;;  %v1271_v25 = vld [vmem:[%s1643_s2 + $0x20] ss:$8 sps:$4 sm:$0xff] (!%p288_p2)  }
   0xd   : > { %s1652_s10 = smov (!%p323_p3, %s1102_s10), 1  ;;  %865 = vmatprep.subr.bf16.mxu1 %v1266_v18  ;;  %v1272_v26 = vld [vmem:[%s1643_s2 + $0x34] ss:$8 sps:$4 sm:$0xff]   ;;  %v1240_v27 = vld [vmem:[%s1642_s1 + $0x80] ss:$8 sps:$4 sm:$0xff]   ;;  %vm915_vm0 = vcmask 1041408  }
   0xe   : > { %s1189_s12 = sshll.u32 %s1652_s10, 3  ;;  %v1241_v28 = vld [vmem:[%s1642_s1 + $0x94] ss:$8 sps:$4 sm:$0xff]   ;;  %v1243_v29 = vld [vmem:[%s1642_s1 + $0x90] ss:$8 sps:$4 sm:$0xff]   ;;  %v1319_v4 = vmov 0  }
   0xf   : > { %537 = vmatpush1.bf16.msra.mxu0 %v1222_v5  ;;  %s327_s17 = scalar_lea.vmem %s1641_s0, %s1189_s12  ;;  %v1274_v30 = vld [vmem:[%s1643_s2 + $0x30] ss:$8 sps:$4 sm:$0xff]   ;;  %v1244_v31 = vld [vmem:[%s1642_s1 + $0xa4] ss:$8 sps:$4 sm:$0xff]   ;;  %v1277_v33 = vld [vmem:[%s1643_s2 + $0x40] ss:$8 sps:$4 sm:$0xff]   ;;  %1213 = vset.pattern.permute.xlu0 %v1319_v4  ;;  %s332_s16 = scalar_lea.vmem %s1650_s9, %s1189_s12 }
  0x10   : > { %538 = vmatprep.subr.bf16.mxu0 %v1223_v6  ;;  %v1428_v14 = vld [vmem:[%s327_s17] sm:$0xff]  ;;  %866 = vmatpush1.bf16.msra.mxu1 %v1268_v21  ;;  %v1278_v34 = vld [vmem:[%s1643_s2 + $0x54] ss:$8 sps:$4 sm:$0xff]   ;;  %v1280_v37 = vld [vmem:[%s1643_s2 + $0x50] ss:$8 sps:$4 sm:$0xff]   ;;  %vm911_vm1 = vcmask 31744  }
  0x11   : > { %v1432_v15 = vcombine.high %v1428_v14, %v1428_v14  ;;  %867 = vmatprep.subr.bf16.mxu1 %v1269_v22  ;;  %v1275_v32 = vld [vmem:[%s1643_s2 + $0x44] ss:$8 sps:$4 sm:$0xff]   ;;  %v1246_v35 = vld [vmem:[%s1642_s1 + $0xa0] ss:$8 sps:$4 sm:$0xff]   ;;  %v1247_v36 = vld [vmem:[%s1642_s1 + $0xb4] ss:$8 sps:$4 sm:$0xff]   ;;  %v1558_v56 = vpack.c.bf16 %v1428_v14, %v1428_v14 }
  0x12   : > { %v1281_v38 = vld [vmem:[%s1643_s2 + $0x64] ss:$8 sps:$4 sm:$0xff]   ;;  %v1249_v39 = vld [vmem:[%s1642_s1 + $0xb0] ss:$8 sps:$4 sm:$0xff]   ;;  %v1283_v41 = vld [vmem:[%s1643_s2 + $0x60] ss:$8 sps:$4 sm:$0xff]  }
  0x13   : > { %539 = vmatpush1.bf16.msra.mxu0 %v1225_v7  ;;  %v1448_v20 = vpack.c.bf16 %v1432_v15, %v1432_v15  ;;  %v1250_v40 = vld [vmem:[%s1642_s1 + $0xc4] ss:$8 sps:$4 sm:$0xff]   ;;  %v1284_v42 = vld [vmem:[%s1643_s2 + $0x74] ss:$8 sps:$4 sm:$0xff]   ;;  %v1252_v43 = vld [vmem:[%s1642_s1 + $0xc0] ss:$8 sps:$4 sm:$0xff]   ;;  %v577_v7 = vlaneseq }
  0x14   : > { %540 = vmatprep.subr.bf16.mxu0 %v1226_v8  ;;  %868 = vmatpush1.bf16.msra.mxu1 %v1271_v25  ;;  %v1253_v44 = vld [vmem:[%s1642_s1 + $0xd4] ss:$8 sps:$4 sm:$0xff]   ;;  %v1286_v45 = vld [vmem:[%s1643_s2 + $0x70] ss:$8 sps:$4 sm:$0xff]   ;;  %v1287_v46 = vld [vmem:[%s1643_s2 + $0x84] ss:$8 sps:$4 sm:$0xff]  }
  0x15   : > { %564 = vmatprep.mubr.bf16.mxu0 %v1448_v20  ;;  %869 = vmatprep.subr.bf16.mxu1 %v1272_v26  ;;  %v1255_v47 = vld [vmem:[%s1642_s1 + $0xd0] ss:$8 sps:$4 sm:$0xff]   ;;  %v1256_v48 = vld [vmem:[%s1642_s1 + $0xe4] ss:$8 sps:$4 sm:$0xff]   ;;  %v1289_v49 = vld [vmem:[%s1643_s2 + $0x80] ss:$8 sps:$4 sm:$0xff]  }
  0x16   : > { %v1290_v50 = vld [vmem:[%s1643_s2 + $0x94] ss:$8 sps:$4 sm:$0xff]   ;;  %v1258_v51 = vld [vmem:[%s1642_s1 + $0xe0] ss:$8 sps:$4 sm:$0xff]   ;;  %v1292_v53 = vld [vmem:[%s1643_s2 + $0x90] ss:$8 sps:$4 sm:$0xff]  }
  0x17   : > { %541 = vmatpush1.bf16.msra.mxu0 %v1228_v9  ;;  %v1259_v52 = vld [vmem:[%s1642_s1 + $0xf4] ss:$8 sps:$4 sm:$0xff]   ;;  %v1293_v54 = vld [vmem:[%s1643_s2 + $0xa4] ss:$8 sps:$4 sm:$0xff]   ;;  %v1261_v55 = vld [vmem:[%s1642_s1 + $0xf0] ss:$8 sps:$4 sm:$0xff]  }
  0x18   : > { %542 = vmatprep.subr.bf16.mxu0 %v1229_v10  ;;  %870 = vmatpush1.bf16.msra.mxu1 %v1274_v30  ;;  %v1295_v57 = vld [vmem:[%s1643_s2 + $0xa0] ss:$8 sps:$4 sm:$0xff]   ;;  %v1296_v58 = vld [vmem:[%s1643_s2 + $0xb4] ss:$8 sps:$4 sm:$0xff]   ;;  %v1298_v59 = vld [vmem:[%s1643_s2 + $0xb0] ss:$8 sps:$4 sm:$0xff]  }
  0x19   : > { %871 = vmatprep.subr.bf16.mxu1 %v1275_v32  ;;  %v1299_v60 = vld [vmem:[%s1643_s2 + $0xc4] ss:$8 sps:$4 sm:$0xff]   ;;  %v1301_v61 = vld [vmem:[%s1643_s2 + $0xc0] ss:$8 sps:$4 sm:$0xff]   ;;  %v1302_v62 = vld [vmem:[%s1643_s2 + $0xd4] ss:$8 sps:$4 sm:$0xff]  }
  0x1a   : > { %v1304_v63 = vld [vmem:[%s1643_s2 + $0xd0] ss:$8 sps:$4 sm:$0xff]   ;;  %v1305_v0 = vld [vmem:[%s1643_s2 + $0xe4] ss:$8 sps:$4 sm:$0xff]   ;;  %v1307_v1 = vld [vmem:[%s1643_s2 + $0xe0] ss:$8 sps:$4 sm:$0xff]  }
  0x1b   : > { %543 = vmatpush1.bf16.msra.mxu0 %v1231_v11  ;;  %v1308_v2 = vld [vmem:[%s1643_s2 + $0xf4] ss:$8 sps:$4 sm:$0xff]   ;;  %v1310_v3 = vld [vmem:[%s1643_s2 + $0xf0] ss:$8 sps:$4 sm:$0xff]   ;;  %v905_v5 = vld [vmem:[%s1647_s6] sm:$0xff]  ;;  %v578_v8 = vshrl.u32 %v577_v7, 7 }
  0x1c   : > { %544 = vmatprep.subr.bf16.mxu0 %v1232_v12  ;;  %872 = vmatpush1.bf16.msra.mxu1 %v1277_v33  ;;  %v984_v6 = vld [vmem:[%s1649_s8] sm:$0xf]  ;;  %v1146_v25 = vld [vmem:[%s1645_s4 + $0x8] sm:$0xff]  }
  0x1d   : > { %873 = vmatprep.subr.bf16.mxu1 %v1278_v34  ;;  %908 = vperm.xlu0 %1213, %v905_v5   ;;  %v573_v9 = vld [vmem:[%s1644_s3] sm:$0xff]   ;;  %v579_v11 = vsub.s32 0, %v578_v8  ;;  %v601_v12 = vsub.s32 1, %v578_v8 }
  0x1e   : > { %v575_v10 = vld [vmem:[%s1645_s4] sm:$0xff]   ;;  %v595_v21 = vunpack.c.h.bf16 %v573_v9 }
  0x1f   : > { %545 = vmatpush1.bf16.msra.mxu0 %v1234_v13  ;;  %v574_v13 = vunpack.c.l.bf16 %v573_v9  ;;  %v576_v16 = vunpack.c.l.bf16 %v575_v10  ;;  %v598_v22 = vunpack.c.h.bf16 %v575_v10  ;;  %v917_v9 = vsel %vm915_vm0, %v1558_v56, 0  ;;  %v904_v10 = vld [vmem:[%s1646_s5] sm:$0xf] }
  0x20   : > { %546 = vmatprep.subr.bf16.mxu0 %v1235_v19  ;;  %874 = vmatpush1.bf16.msra.mxu1 %v1280_v37  ;;  %v623_v19 = vsub.s32 2, %v578_v8  ;;  %v645_v37 = vsub.s32 3, %v578_v8 }
  0x21   : > { %875 = vmatprep.subr.bf16.mxu1 %v1281_v38  ;;  %987 = vperm.xlu0 %1213, %v984_v6  }
  0x23   : > { %547 = vmatpush1.bf16.msra.mxu0 %v1237_v23 }
  0x24   : > { %548 = vmatprep.subr.bf16.mxu0 %v1238_v24  ;;  %876 = vmatpush1.bf16.msra.mxu1 %v1283_v41  ;;  %v1145_v24 = vld [vmem:[%s1644_s3 + $0x8] sm:$0xff]  }
  0x25   : > { %877 = vmatprep.subr.bf16.mxu1 %v1284_v42  ;;  %v617_v34 = vunpack.c.l.bf16 %v1145_v24 }
  0x27   : > { %549 = vmatpush1.bf16.msra.mxu0 %v1240_v27 }
  0x28   : > { %550 = vmatprep.subr.bf16.mxu0 %v1241_v28  ;;  %878 = vmatpush1.bf16.msra.mxu1 %v1286_v45 }
  0x29   : > { %879 = vmatprep.subr.bf16.mxu1 %v1287_v46 }
  0x2b   : > { %551 = vmatpush1.bf16.msra.mxu0 %v1243_v29 }
  0x2c   : > { %552 = vmatprep.subr.bf16.mxu0 %v1244_v31  ;;  %880 = vmatpush1.bf16.msra.mxu1 %v1289_v49  ;;  %v642_v49 = vunpack.c.h.bf16 %v1146_v25 }
  0x2d   : > { %881 = vmatprep.subr.bf16.mxu1 %v1290_v50 }
  0x2f   : > { %553 = vmatpush1.bf16.msra.mxu0 %v1246_v35  ;;  %v620_v35 = vunpack.c.l.bf16 %v1146_v25 }
  0x30   : > { %554 = vmatprep.subr.bf16.mxu0 %v1247_v36  ;;  %882 = vmatpush1.bf16.msra.mxu1 %v1292_v53 }
  0x31   : > { %883 = vmatprep.subr.bf16.mxu1 %v1293_v54 }
  0x33   : > { %555 = vmatpush1.bf16.msra.mxu0 %v1249_v39 }
  0x34   : > { %556 = vmatprep.subr.bf16.mxu0 %v1250_v40  ;;  %884 = vmatpush1.bf16.msra.mxu1 %v1295_v57 }
  0x35   : > { %885 = vmatprep.subr.bf16.mxu1 %v1296_v58 }
  0x37   : > { %557 = vmatpush1.bf16.msra.mxu0 %v1252_v43 }
  0x38   : > { %558 = vmatprep.subr.bf16.mxu0 %v1253_v44  ;;  %886 = vmatpush1.bf16.msra.mxu1 %v1298_v59 }
  0x39   : > { %887 = vmatprep.subr.bf16.mxu1 %v1299_v60 }
  0x3b   : > { %559 = vmatpush1.bf16.msra.mxu0 %v1255_v47 }
  0x3c   : > { %560 = vmatprep.subr.bf16.mxu0 %v1256_v48  ;;  %888 = vmatpush1.bf16.msra.mxu1 %v1301_v61  ;;  %v639_v48 = vunpack.c.h.bf16 %v1145_v24 }
  0x3d   : > { %889 = vmatprep.subr.bf16.mxu1 %v1302_v62 }
  0x3f   : > { %561 = vmatpush1.bf16.msra.mxu0 %v1258_v51 }
  0x40   : > { %562 = vmatprep.subr.bf16.mxu0 %v1259_v52  ;;  %890 = vmatpush1.bf16.msra.mxu1 %v1304_v63 }
  0x41   : > { %891 = vmatprep.subr.bf16.mxu1 %v1305_v0 }
  0x43   : > { %563 = vmatpush1.bf16.msra.mxu0 %v1261_v55 }
  0x44   : > { %892 = vmatpush1.bf16.msra.mxu1 %v1307_v1 }
  0x45   : > { %893 = vmatprep.subr.bf16.mxu1 %v1308_v2 }
  0x46   : > { %565 = vmatmul.mubr.bf16.vlgmr.msra.gmra.mrb[0].mxu0 %v1558_v56 }
  0x47   : > { %1031 = vmatprep.mubr.bf16.mxu0 %v1319_v4 }
  0x48   : > { %894 = vmatpush1.bf16.msra.mxu1 %v1310_v3 }
  0x49   : > { %1183 = vmatprep.subr.msk.bf16.mxu1 %vm915_vm0, %v1448_v20 }
 0x119   : > { %v566_v17 = vpop.f32.mrb[0].mxu0 }
 0x11a   : > { %v580_v18 = vrot.slane %v566_v17, %v579_v11  ;;  %v568_v20 = vpop.f32.mrb[1].mxu0  ;;  %v602_v23 = vrot.slane %v566_v17, %v601_v12  ;;  %v624_v36 = vrot.slane %v566_v17, %v623_v19  ;;  %v646_v47 = vrot.slane %v566_v17, %v645_v37 }
 0x11b   : > { %v586_v26 = vrot.slane %v568_v20, %v579_v11  ;;  %v570_v27 = vpop.f32.mrb[2].mxu0  ;;  %v608_v33 = vrot.slane %v568_v20, %v601_v12  ;;  %v630_v42 = vrot.slane %v568_v20, %v623_v19  ;;  %v652_v54 = vrot.slane %v568_v20, %v645_v37  ;;  %v909_v11 = vpop.permute.xlu0 %908 }
 0x11c   : > { %v581_v28 = vmul.f32 %v580_v18, %v574_v13  ;;  %v589_v29 = vmul.f32 %v580_v18, %v576_v16  ;;  %v571_v30 = vpop.f32.mrb[3].mxu0  ;;  %v603_v38 = vmul.f32 %v602_v23, %v595_v21  ;;  %v611_v39 = vmul.f32 %v602_v23, %v598_v22 }
 0x11d   : > { %v587_v31 = vmul.f32 %v586_v26, %v576_v16  ;;  %v591_v32 = vmul.f32 %v586_v26, %v574_v13  ;;  %v609_v44 = vmul.f32 %v608_v33, %v598_v22  ;;  %v613_v45 = vmul.f32 %v608_v33, %v595_v21 }
 0x11e   : > { %v625_v50 = vmul.f32 %v624_v36, %v617_v34  ;;  %v633_v51 = vmul.f32 %v624_v36, %v620_v35  ;;  %v631_v55 = vmul.f32 %v630_v42, %v620_v35  ;;  %v635_v58 = vmul.f32 %v630_v42, %v617_v34 }
 0x11f   : > { %v588_v40 = vsub.f32 %v581_v28, %v587_v31  ;;  %v592_v41 = vadd.f32 %v591_v32, %v589_v29  ;;  %v647_v61 = vmul.f32 %v646_v47, %v639_v48  ;;  %v655_v62 = vmul.f32 %v646_v47, %v642_v49  ;;  %v981_v31 = vld [vmem:[%s1648_s7] sm:$0x3]  ;;  %v988_v32 = vpop.permute.xlu0 %987 }
 0x120   : > { %v657_v1 = vmul.f32 %v652_v54, %v639_v48  ;;  %v653_v3 = vmul.f32 %v652_v54, %v642_v49 }
 0x121   : > { %v604_v43 = vadd.f32 %v603_v38, %v588_v40  ;;  %v612_v46 = vadd.f32 %v611_v39, %v592_v41 }
 0x123   : > { %v610_v52 = vsub.f32 %v604_v43, %v609_v44  ;;  %v614_v53 = vadd.f32 %v613_v45, %v612_v46 }
 0x125   : > { %v634_v57 = vadd.f32 %v633_v51, %v614_v53  ;;  %v626_v59 = vadd.f32 %v625_v50, %v610_v52 }
 0x127   : > { %v636_v60 = vadd.f32 %v635_v58, %v634_v57  ;;  %v632_v63 = vsub.f32 %v626_v59, %v631_v55 }
 0x129   : > { %v656_v0 = vadd.f32 %v655_v62, %v636_v60  ;;  %v648_v2 = vadd.f32 %v647_v61, %v632_v63 }
 0x12b   : > { %v658_v5 = vadd.f32 %v657_v1, %v656_v0  ;;  %v654_v6 = vsub.f32 %v648_v2, %v653_v3 }
 0x12d   : > { %v1197_v7 = vpack.c.bf16 %v658_v5, %v658_v5  ;;  %v1196_v8 = vpack.c.bf16 %v654_v6, %v654_v6 }
 0x12f   : > { %895 = vmatprep.mubr.bf16.mxu1 %v1197_v7 }
 0x130   : > { %896 = vmatmul.mubr.bf16.vlgmr.msra.gmra.mrb[0].mxu1 %v1196_v8 }
 0x131   : > { %923 = vmatpush1.bf16.msra.mxu1 %v917_v9  ;;  %954 = vmatprep.mubr.bf16.mxu1 %v1319_v4 }
 0x13c   : > { %1184 = vmatmul.mubr.msk.bf16.vlgmr.msra.gmra.mrb[0].mxu1 %vm911_vm1, %v904_v10 }
 0x20f   : > { %v956_v12 = vpop.f32.mrb[0].mxu1 }
 0x210   : > { %v957_v13 = vadd.f32 %v956_v12, %v909_v11  ;;  %v958_v16 = vpop.f32.mrb[1].mxu1 }
 0x211   : > { %v959_v17 = vadd.f32 %v958_v16, %v909_v11  ;;  %v960_v18 = vpop.f32.mrb[2].mxu1 }
 0x212   : > { %vm965_vm2 = vcmp.ge.f32.partialorder %v957_v13, 0.0  ;;  %v967_v56 = vmul.f32 0.25, %v957_v13  ;;  %v961_v19 = vpop.f32.mrb[3].mxu1 }
 0x213   : > { %vm966_vm3 = vcmp.ge.f32.partialorder %v959_v17, 0.0  ;;  %v968_v20 = vmul.f32 0.25, %v959_v17 }
 0x214   : > { %v969_v21 = vsel %vm965_vm2, %v957_v13, %v967_v56 }
 0x215   : > { %v973_v4 = vrot.slane %v969_v21, 4  ;;  %v970_v22 = vsel %vm966_vm3, %v959_v17, %v968_v20 }
 0x216   : > { %v974_v23 = vrot.slane %v970_v22, 4 }
 0x217   : > { %v977_v24 = vadd.f32 %v973_v4, %v969_v21 }
 0x218   : > { %v978_v25 = vadd.f32 %v974_v23, %v970_v22 }
 0x219   : > { %v979_v26 = vadd.f32 %v977_v24, %v1428_v14 }
 0x21a   : > { %v980_v27 = vadd.f32 %v978_v25, %v1432_v15 }
 0x21b   : > { %v982_v28 = vpack.c.bf16 %v979_v26, %v979_v26 }
 0x21c   : > { %v983_v29 = vpack.c.bf16 %v980_v27, %v980_v27 }
 0x21d   : > { %v994_v30 = vsel %vm915_vm0, %v982_v28, 0 }
 0x21e   : > { %1185 = vmatprep.subr.msk.bf16.mxu0 %vm915_vm0, %v983_v29 }
 0x21f   : > { %1000 = vmatpush1.bf16.msra.mxu0 %v994_v30 }
 0x222   : > { %1186 = vmatmul.mubr.msk.bf16.vlgmr.msra.gmra.mrb[4].mxu0 %vm911_vm1, %v981_v31 }
 0x2f5   : > { %v1033_v33 = vpop.f32.mrb[4].mxu0 }
 0x2f6   : > { %v1034_v34 = vadd.f32 %v1033_v33, %v988_v32  ;;  %v1035_v35 = vpop.f32.mrb[5].mxu0 }
 0x2f7   : > { %v1036_v36 = vadd.f32 %v1035_v35, %v988_v32  ;;  %v1037_v37 = vpop.f32.mrb[6].mxu0 }
 0x2f8   : > { %v1040_v38 = vadd.f32 %v1034_v34, %v1428_v14  ;;  %v1038_v39 = vpop.f32.mrb[7].mxu0 }
 0x2f9   : > { %v1041_v40 = vadd.f32 %v1036_v36, %v1432_v15 }
 0x2fb   : > { %v1044_v41 = vcombine.low %v1040_v38, %v1041_v40 }
 0x2fd   : > { %1046 = vst [vmem:[%s332_s16] sm:$0xff] %v1044_v41 }
 0x2fe PF: > { %s19_s30 = sadd.s32 1, %s1317_s30  }
 0x2ff   : > { %p16_p4 = scmp.ge.s32.totalorder %s19_s30, 4  }
 0x301   :  { %18 = sbr.rel (!%p16_p4) target bundleno = 1 (0x1), region = 92 }

</bundles_post_ra>
